<compile_context>
chip_gen: v5e
topology: v5e:2x2
jax: 0.10.0
libtpu: 0.0.40
codegen_flags: <defaults>
</compile_context>

<pallas_src>
import functools
import math

import jax
import jax.numpy as jnp
from jax.experimental import pallas as pl
from jax.experimental.pallas import tpu as pltpu


_FAST_PATH_BYTES = 1 << 20     # < 1 MiB: kernel launch overhead dwarfs HBM time
_MAX_ROW_BYTES = 6 << 20       # single-row cap so slab + resident const fit VMEM
_VMEM_LIMIT_BYTES = 32 << 20   # safe on v5e/v6e (128 MiB phys) and v7x (64 MiB phys)
_RING_DEPTH = 4                # in-flight HBM write DMAs per core


def _default_tile_bytes() -> int:
    """Per-generation target for bytes of output written per grid step."""
    try:
        kind = jax.devices()[0].device_kind.lower()
    except Exception:  # pragma: no cover - defensive
        kind = ""
    if "v7" in kind:
        return 12 << 20   # ~3.2 TB/s HBM: bigger tiles; slab is single-buffered
    if "v5 lite" in kind or "v5e" in kind or "v5lite" in kind:
        return 6 << 20    # ~0.8 TB/s HBM: 6 MiB already makes step overhead tiny
    return 8 << 20        # v6e / default


def _constant_dma_kernel(const_ref, out_ref, slab_ref, sem_ref, *, depth):
    """Pure-DMA batch replication.

    const_ref : (1, ncols) VMEM, grid-invariant (resident) constant super-row.
    out_ref   : (rows, ncols) raw HBM ref (memory_space=pl.ANY), DMA-written only.
    slab_ref  : (tb, ncols) VMEM scratch slab, filled once per core.
    sem_ref   : (depth,) DMA semaphores — ring of in-flight HBM writes.
    """
    o = pl.program_id(0)            # "parallel" axis: one value per TensorCore
    j = pl.program_id(1)            # "arbitrary" axis: core-local step index
    n_inner = pl.num_programs(1)
    tb = slab_ref.shape[0]
    rows = out_ref.shape[0]

    # Fill the slab with the constant once per core (j is core-local, so this
    # runs exactly once on each core before that core's first DMA start).
    @pl.when(j == 0)
    def _fill_slab():
        slab_ref[...] = jnp.broadcast_to(const_ref[...], slab_ref.shape)

    # Global row-tile index -> first output row of this step's window.  The
    # clamp keeps the last (possibly over-scheduled) window in bounds; any
    # overlapping rows are rewritten with identical bytes (benign).
    t = o * n_inner + j
    start = jnp.minimum(t * tb, rows - tb)
    slot = j % depth

    # Retire the copy issued `depth` steps ago on this slot.  All ring copies
    # have the same byte count, so any same-shaped descriptor performs the wait.
    @pl.when(j >= depth)
    def _retire_old():
        pltpu.make_async_copy(
            slab_ref, out_ref.at[pl.ds(0, tb), :], sem_ref.at[slot]).wait()

    # Issue this step's HBM write; up to `depth` copies stay in flight.
    pltpu.make_async_copy(
        slab_ref, out_ref.at[pl.ds(start, tb), :], sem_ref.at[slot]).start()

    # Last core-local step: drain every outstanding copy (exactly one per slot).
    @pl.when(j == n_inner - 1)
    def _drain():
        for s in range(depth):
            pltpu.make_async_copy(
                slab_ref, out_ref.at[pl.ds(0, tb), :], sem_ref.at[s]).wait()


def constant_input_forward(x, const, *, target_tile_bytes=None, force_kernel=False):
    """Replicates `const` (1, C, S, S) across the batch dim of `x`.

    Args:
      x:     (B, ...) — only x.shape[0] matters (as in the PyTorch module).
      const: (1, C, S, S) learned constant parameter.
      target_tile_bytes: optional override of the per-step DMA tile size.
      force_kernel: skip the small-output fast path (used for testing).

    Returns:
      (B, C, S, S) array with the dtype of `const`.
    """
    batch = x.shape[0]
    _, c, h, w = const.shape
    chw = c * h * w
    dtype = const.dtype
    itemsize = jnp.dtype(dtype).itemsize
    out_shape4d = (batch, c, h, w)

    if batch == 0:
        return jnp.zeros(out_shape4d, dtype)

    total_bytes = batch * chw * itemsize
    if not force_kernel and total_bytes < _FAST_PATH_BYTES:
        # Tiny output: pallas_call overhead dwarfs the HBM time, and XLA can
        # usually fuse this broadcast into the consumer without materializing.
        return jnp.broadcast_to(const, out_shape4d)

    # ---- Lane-dense layout: fuse G batch rows into one 128-lane-aligned
    #      super-row when C*H*W is not already a multiple of 128. ----
    if chw % 128 == 0:
        g = 1
    else:
        g0 = 128 // math.gcd(chw, 128)        # lcm(chw, 128) // chw
        g = g0 if batch % g0 == 0 else 1      # fall back to unaligned rows
    rows = batch // g
    ncols = g * chw
    row_bytes = ncols * itemsize

    if row_bytes > _MAX_ROW_BYTES:
        # TODO(synk): add a CHW-split ("arbitrary") grid axis for giant
        # per-image rows instead of falling back to XLA's broadcast.
        return jnp.broadcast_to(const, out_shape4d)

    if target_tile_bytes is None:
        target_tile_bytes = _default_tile_bytes()

    # ---- Batch-row tile: dtype-aware sublane rounding (8 f32/16 bf16/32 i8). ----
    sub = max(8, 32 // max(1, itemsize))
    tb = max(1, target_tile_bytes // row_bytes)
    if tb >= sub:
        tb = (tb // sub) * sub
    tb = min(tb, rows)

    row_tiles = pl.cdiv(rows, tb)
    # Split across the two v7x TensorCores only when there is enough work that
    # the (<= 1 tile) over-scheduling from the split is negligible.
    osplit = 2 if row_tiles >= 8 else 1
    n_inner = pl.cdiv(row_tiles, osplit)
    depth = max(1, min(_RING_DEPTH, n_inner))

    # Constant presented as one lane-aligned super-row (tiny wrapper-side op).
    const_row = const.reshape(1, chw)
    if g > 1:
        const_row = jnp.tile(const_row, (1, g))

    out_flat = pl.pallas_call(
        functools.partial(_constant_dma_kernel, depth=depth),
        out_shape=jax.ShapeDtypeStruct((rows, ncols), dtype),
        grid_spec=pltpu.PrefetchScalarGridSpec(
            num_scalar_prefetch=0,
            grid=(osplit, n_inner),
            in_specs=[
                # Grid-invariant index_map: constant row stays VMEM-resident.
                pl.BlockSpec((1, ncols), lambda o, j: (0, 0)),
            ],
            # Raw HBM output: no VMEM double-buffer, written only by DMA.
            out_specs=pl.BlockSpec(memory_space=pl.ANY),
            scratch_shapes=[
                pltpu.VMEM((tb, ncols), dtype),      # replication slab
                pltpu.SemaphoreType.DMA((depth,)),   # in-flight write ring
            ],
        ),
        compiler_params=pltpu.CompilerParams(
            dimension_semantics=("parallel", "arbitrary"),
            vmem_limit_bytes=_VMEM_LIMIT_BYTES,
        ),
    )(const_row)

    return out_flat.reshape(out_shape4d)


if __name__ == "__main__":
    key = jax.random.PRNGKey(0)
    k_const, k_x, k_const2 = jax.random.split(key, 3)

    # --- Case 1: module-sized example (channel=4, size=4, batch=2). ---
    channel, size, batch = 4, 4, 2
    const = jax.random.normal(k_const, (1, channel, size, size), jnp.float32)
    # Dummy input — only its batch dim is consumed by the forward pass.
    x = jax.random.normal(k_x, (batch, channel, 16, 16), jnp.float32)
    ref = jnp.broadcast_to(const, (batch, channel, size, size))

    out_fast = jax.block_until_ready(constant_input_forward(x, const))
    assert out_fast.shape == ref.shape
    assert jnp.array_equal(out_fast, ref)

    # Same shape, but force the Pallas DMA kernel path (lane-fused super-row).
    out_kern = jax.block_until_ready(
        constant_input_forward(x, const, force_kernel=True))
    assert out_kern.shape == ref.shape
    assert jnp.array_equal(out_kern, ref)

    # --- Case 2: StyleGAN-like constant; a small tile override exercises the
    #     multi-tile DMA ring, the retire/drain logic and both grid axes. ---
    channel2, size2, batch2 = 512, 4, 64
    const2 = jax.random.normal(k_const2, (1, channel2, size2, size2), jnp.float32)
    x2 = jnp.zeros((batch2, channel2), jnp.float32)   # only batch dim is used
    ref2 = jnp.broadcast_to(const2, (batch2, channel2, size2, size2))
    out2 = jax.block_until_ready(
        constant_input_forward(x2, const2, force_kernel=True,
                               target_tile_bytes=128 * 1024))
    assert out2.shape == ref2.shape
    assert jnp.array_equal(out2, ref2)

    print("KERNEL_OK")
</pallas_src>

<mosaic_0001>
module attributes {stable_mosaic.version = 11 : i64} {
  func.func @_constant_dma_kernel(%arg0: i32, %arg1: i32, %arg2: memref<1x128xf32, #tpu.memory_space<vmem>>, %arg3: memref<1x128xf32, #tpu.memory_space<any>>, %arg4: memref<1x128xf32, #tpu.memory_space<vmem>>, %arg5: memref<1x!tpu.dma_semaphore, #tpu.memory_space<semaphore_mem>>) attributes {dimension_semantics = [#tpu.dimension_semantics<parallel>, #tpu.dimension_semantics<arbitrary>], iteration_bounds = array<i64: 1, 1>, scalar_prefetch = 0 : i64, scratch_operands = 2 : i64, tpu.core_type = #tpu.core_type<tc>, window_params = [{pipeline_mode = #tpu.pipeline_mode<synchronous>, transform_indices = @transform_0, window_bounds = array<i64: 1, 128>}, {}]} {
    %c0_i32 = arith.constant 0 : i32
    %0 = arith.cmpi eq, %arg1, %c0_i32 : i32
    %1 = arith.extui %0 : i1 to i32
    %c0_i32_0 = arith.constant 0 : i32
    %2 = arith.cmpi ne, %1, %c0_i32_0 : i32
    scf.if %2 {
      %c0 = arith.constant 0 : index
      %c0_14 = arith.constant 0 : index
      %26 = vector.load %arg2[%c0, %c0_14] : memref<1x128xf32, #tpu.memory_space<vmem>>, vector<1x128xf32>
      %c0_15 = arith.constant 0 : index
      %c0_16 = arith.constant 0 : index
      %27 = vector.load %arg4[%c0_15, %c0_16] : memref<1x128xf32, #tpu.memory_space<vmem>>, vector<1x128xf32>
      tpu.vector_store %arg4[%c0_15, %c0_16], %26 {strides = array<i32>} : memref<1x128xf32, #tpu.memory_space<vmem>>, vector<1x128xf32>,
    } else {
    }
    %c1_i32 = arith.constant 1 : i32
    %3 = arith.muli %arg0, %c1_i32 : i32
    %4 = arith.addi %3, %arg1 : i32
    %c1_i32_1 = arith.constant 1 : i32
    %5 = arith.muli %4, %c1_i32_1 : i32
    %c0_i32_2 = arith.constant 0 : i32
    %6 = arith.minsi %5, %c0_i32_2 : i32
    %c1_i32_3 = arith.constant 1 : i32
    %c0_i32_4 = arith.constant 0 : i32
    %7 = arith.cmpi eq, %c1_i32_3, %c0_i32_4 : i32
    %c1_i32_5 = arith.constant 1 : i32
    %8 = arith.select %7, %c1_i32_5, %c1_i32_3 : i32
    %9 = arith.remsi %arg1, %8 : i32
    %c0_i32_6 = arith.constant 0 : i32
    %10 = arith.cmpi ne, %9, %c0_i32_6 : i32
    %c0_i32_7 = arith.constant 0 : i32
    %11 = arith.cmpi slt, %9, %c0_i32_7 : i32
    %c0_i32_8 = arith.constant 0 : i32
    %12 = arith.cmpi slt, %8, %c0_i32_8 : i32
    %13 = arith.xori %11, %12 : i1
    %14 = arith.andi %13, %10 : i1
    %15 = arith.addi %9, %8 : i32
    %16 = arith.select %14, %15, %9 : i32
    %c1_i32_9 = arith.constant 1 : i32
    %17 = arith.cmpi sge, %arg1, %c1_i32_9 : i32
    %18 = arith.extui %17 : i1 to i32
    %c0_i32_10 = arith.constant 0 : i32
    %19 = arith.cmpi ne, %18, %c0_i32_10 : i32
    scf.if %19 {
      %c0_i32_14 = arith.constant 0 : i32
      %c0_i32_15 = arith.constant 0 : i32
      %26 = tpu.memref_slice %arg3[%c0_i32_14, %c0_i32_15] : memref<1x128xf32, #tpu.memory_space<any>> -> memref<1x128xf32, #tpu.memory_space<any>>
      %27 = tpu.memref_slice %arg5[%16] : memref<1x!tpu.dma_semaphore, #tpu.memory_space<semaphore_mem>> -> memref<1x!tpu.dma_semaphore, #tpu.memory_space<semaphore_mem>>
      %28 = tpu.memref_squeeze %27 : memref<1x!tpu.dma_semaphore, #tpu.memory_space<semaphore_mem>> -> memref<!tpu.dma_semaphore, #tpu.memory_space<semaphore_mem>>
      tpu.wait_dma2 semaphore(%28 : memref<!tpu.dma_semaphore, #tpu.memory_space<semaphore_mem>>) src(%arg4 : memref<1x128xf32, #tpu.memory_space<vmem>>) dst(%26 : memref<1x128xf32, #tpu.memory_space<any>>)
    } else {
    }
    %c0_i32_11 = arith.constant 0 : i32
    %20 = tpu.memref_slice %arg3[%6, %c0_i32_11] : memref<1x128xf32, #tpu.memory_space<any>> -> memref<1x128xf32, #tpu.memory_space<any>>
    %21 = tpu.memref_slice %arg5[%16] : memref<1x!tpu.dma_semaphore, #tpu.memory_space<semaphore_mem>> -> memref<1x!tpu.dma_semaphore, #tpu.memory_space<semaphore_mem>>
    %22 = tpu.memref_squeeze %21 : memref<1x!tpu.dma_semaphore, #tpu.memory_space<semaphore_mem>> -> memref<!tpu.dma_semaphore, #tpu.memory_space<semaphore_mem>>
    tpu.enqueue_dma source(%arg4 : memref<1x128xf32, #tpu.memory_space<vmem>>) target(%20 : memref<1x128xf32, #tpu.memory_space<any>>) target_semaphore(%22 : memref<!tpu.dma_semaphore, #tpu.memory_space<semaphore_mem>>)
    %c0_i32_12 = arith.constant 0 : i32
    %23 = arith.cmpi eq, %arg1, %c0_i32_12 : i32
    %24 = arith.extui %23 : i1 to i32
    %c0_i32_13 = arith.constant 0 : i32
    %25 = arith.cmpi ne, %24, %c0_i32_13 : i32
    scf.if %25 {
      %c0_i32_14 = arith.constant 0 : i32
      %c0_i32_15 = arith.constant 0 : i32
      %c0_i32_16 = arith.constant 0 : i32
      %26 = tpu.memref_slice %arg3[%c0_i32_15, %c0_i32_16] : memref<1x128xf32, #tpu.memory_space<any>> -> memref<1x128xf32, #tpu.memory_space<any>>
      %27 = tpu.memref_slice %arg5[%c0_i32_14] : memref<1x!tpu.dma_semaphore, #tpu.memory_space<semaphore_mem>> -> memref<1x!tpu.dma_semaphore, #tpu.memory_space<semaphore_mem>>
      %28 = tpu.memref_squeeze %27 : memref<1x!tpu.dma_semaphore, #tpu.memory_space<semaphore_mem>> -> memref<!tpu.dma_semaphore, #tpu.memory_space<semaphore_mem>>
      tpu.wait_dma2 semaphore(%28 : memref<!tpu.dma_semaphore, #tpu.memory_space<semaphore_mem>>) src(%arg4 : memref<1x128xf32, #tpu.memory_space<vmem>>) dst(%26 : memref<1x128xf32, #tpu.memory_space<any>>)
    } else {
    }
    return
  }
  func.func @transform_0(%arg0: i32, %arg1: i32) -> (i32, i32) {
    %c0_i32 = arith.constant 0 : i32
    %c0_i32_0 = arith.constant 0 : i32
    %c0_i32_1 = arith.constant 0 : i32
    return %c0_i32, %c0_i32_0 : i32, i32
  }
}

</mosaic_0001>

<bundles_post_ra>
// kernel: tpu_custom_call.1
= control target key start
LH: loop header
LB: loop body
LE: loop exit
PB: predicated region body
PF: predicated region fallthrough
CT: control target
= control target key end

     0   :  { %6 = vsyncpa [#allocation5], 0  ;;  %s121_s9 = smov [#allocation4]   ;;  %s139_s0 = inlined_call_operand.hbm [shape: f32[1,128], index: 0, kind: input, shape index: {}]   ;;  %s140_s1 = inlined_call_operand.hbm [shape: f32[1,128], index: 1, kind: output, shape index: {}]  }
   0x1   :  { %s12_s8 = sshll.u32 %s139_s0, 4  ;;  %s14_s10 = sshll.u32 %s121_s9, 4  ;;  %s13_s8 = int_to_ptr.hbm [resolvable:$true] %s12_s8  ;;  %s15_s10 = int_to_ptr.vmem [resolvable:$true] %s14_s10 }
   0x2   :  { %17 = dma.hbm_to_vmem [thread:$0]  %s13_s8, 16, %s15_s10, [#allocation5]  }
   0x3   :  { %117 = dma.done.wait [#allocation5], 16  }
   0x4   :  { %118 = vsyncadd [#allocation5], 4294967280  ;;  %s122_s11 = smov [#allocation2]   ;;  %s48_s15 = sshll.u32 %s140_s1, 4  ;;  %v26_v0 = vld [vmem:[#allocation4] sm:$0x1]  ;;  %s49_s15 = int_to_ptr.hbm [resolvable:$true] %s48_s15 }
   0x5   :  { %s46_s12 = sshll.u32 %s122_s11, 4  ;;  %27 = vst [vmem:[#allocation2] sm:$0x1] %v26_v0  ;;  %s47_s12 = int_to_ptr.vmem [resolvable:$true] %s46_s12 }
   0x6   :  { %51 = dma.vmem_to_hbm [thread:$0]  %s47_s12, 16, %s49_s15, [#allocation3] }
   0x7   :  { %119 = dma.done.wait [#allocation3], 16 }
   0x8   :  { %120 = vsyncadd [#allocation3], 4294967280 }
   0x9   :  { %58 = vsyncpa [#allocation5], 1 }
   0xa   :  { %59 = vsyncmov [#allocation3] }
   0xd   :  { %s60_s0 = vpop.sfrf %59 }
   0xe   :  { %p66_p0 = scmp.ne.s32.totalorder %s60_s0, 0 }
  0x10   :  { %64 = shalt.err (%p66_p0)  }

</bundles_post_ra>
